<compile_context>
chip_gen: v7x
topology: tpu7x:2x2x1
jax: 0.10.0
libtpu: 0.0.40
codegen_flags: <defaults>
</compile_context>

<pallas_src>
import functools
import math

import jax
import jax.numpy as jnp
from jax.experimental import pallas as pl
from jax.experimental.pallas import tpu as pltpu


def _round_up(x, m):
    return (x + m - 1) // m * m


_VMEM_CAP = None


def _vmem_cap_bytes():
    """Physical VMEM of the local TPU (0 if unknown)."""
    global _VMEM_CAP
    if _VMEM_CAP is None:
        try:
            _VMEM_CAP = int(pltpu.get_tpu_info().vmem_capacity_bytes)
        except Exception:
            _VMEM_CAP = 0
    return _VMEM_CAP


def _default_row_tile():
    # 512-row tiles reach ~85% of the HBM roofline on the 128 MiB-VMEM parts
    # (v5e/v6e); stay at 256 on v7x (64 MiB) or when the part is unknown.
    return 512 if _vmem_cap_bytes() >= (96 << 20) else 256


def _vmem_limit(needed_bytes):
    # Leave headroom; ceiling ~100 MiB on 128 MiB parts, 64 MiB otherwise.
    ceiling = (100 << 20) if _vmem_cap_bytes() >= (96 << 20) else (64 << 20)
    return int(min(max(needed_bytes + (8 << 20), 32 << 20), ceiling))


# ---------------------------------------------------------------------------
# Kernel 1: dense projection  y = x @ W_t + b   (used for the fused QKV matmul)
# ---------------------------------------------------------------------------
def _dense_kernel(x_ref, w_ref, b_ref, o_ref):
    acc = jnp.dot(x_ref[...], w_ref[...], preferred_element_type=jnp.float32)
    o_ref[...] = (acc + b_ref[...].astype(jnp.float32)).astype(o_ref.dtype)


def dense_pallas(x, w_t, b, *, tm=None):
    """x: [M, K], w_t: [K, N] (transposed nn.Linear weight), b: [N] -> [M, N]."""
    M, K = x.shape
    N = w_t.shape[1]

    if tm is None:
        tm = _default_row_tile()
    tm = min(tm, _round_up(M, 8))          # multiple of 8 sublanes
    Mp = _round_up(M, tm)
    if Mp != M:
        x = jnp.pad(x, ((0, Mp - M), (0, 0)))

    isz = x.dtype.itemsize
    wsz = w_t.dtype.itemsize
    cost = pl.CostEstimate(
        flops=int(2 * Mp * K * N),
        transcendentals=0,
        bytes_accessed=int(isz * (Mp * K + Mp * N) + wsz * (K * N + N)),
    )
    # NOTE(v7x, H=1536, f32): the resident (K, 3H) weight is ~28 MiB; cast the
    # weights to bf16 or tile the N axis if that plus the double-buffered row
    # tiles approaches the 64 MiB cap.
    vmem = _vmem_limit(isz * (2 * tm * K + 2 * tm * N) + wsz * (K * N + N))

    out = pl.pallas_call(
        _dense_kernel,
        out_shape=jax.ShapeDtypeStruct((Mp, N), x.dtype),
        grid_spec=pltpu.PrefetchScalarGridSpec(
            num_scalar_prefetch=0,
            grid=(Mp // tm,),
            in_specs=[
                pl.BlockSpec((tm, K), lambda i: (i, 0)),   # activation tile
                pl.BlockSpec((K, N), lambda i: (0, 0)),    # weight (constant index -> DMA'd once)
                pl.BlockSpec((1, N), lambda i: (0, 0)),    # bias
            ],
            out_specs=pl.BlockSpec((tm, N), lambda i: (i, 0)),
        ),
        compiler_params=pltpu.CompilerParams(
            dimension_semantics=("parallel",),
            vmem_limit_bytes=vmem,
        ),
        cost_estimate=cost,
    )(x, w_t, b.reshape(1, N))
    return out[:M]


# ---------------------------------------------------------------------------
# Kernel 2: masked attention.  One (batch, query-tile) per grid step; all heads
# handled inside the kernel; output stored as a lane-dense (tq, H) slab.
# ---------------------------------------------------------------------------
def _attention_kernel(qkv_ref, mask_ref, o_ref, *, num_heads, head_dim, scale, q_tile):
    H = num_heads * head_dim
    q_start = pl.multiple_of(pl.program_id(1) * q_tile, q_tile)

    valid = mask_ref[0] != 0                      # (tq, S) bool
    neg = jnp.finfo(jnp.float32).min

    ctx_heads = []
    for h in range(num_heads):                    # static unroll over heads
        c0 = h * head_dim
        # Native-dtype tiles straight from the resident QKV slab (no f32 upcast;
        # the MXU accumulates in f32 via preferred_element_type).
        q_h = qkv_ref[0, pl.ds(q_start, q_tile), c0:c0 + head_dim]
        k_h = qkv_ref[0, :, H + c0:H + c0 + head_dim]
        v_h = qkv_ref[0, :, 2 * H + c0:2 * H + c0 + head_dim]

        # Pre-scale q once (tq*Dh multiplies instead of tq*S on the scores).
        q_h = q_h * jnp.asarray(scale, dtype=q_h.dtype)
        s = jnp.einsum("qd,kd->qk", q_h, k_h,
                       preferred_element_type=jnp.float32)          # (tq, S) f32

        # XSoftmax: masked_fill(min) -> softmax -> masked_fill(0).
        s = jnp.where(valid, s, neg)
        m = jnp.max(s, axis=-1, keepdims=True)
        e = jnp.exp(s - m)
        p = e * pl.reciprocal(jnp.sum(e, axis=-1, keepdims=True), approx=True)
        p = jnp.where(valid, p, 0.0)
        # attention dropout is identity in eval mode.

        ctx_heads.append(
            jnp.dot(p.astype(v_h.dtype), v_h, preferred_element_type=jnp.float32))

    # One lane-dense store of the merged-head context.
    ctx = jnp.concatenate(ctx_heads, axis=-1)                        # (tq, H)
    o_ref[...] = ctx[None].astype(o_ref.dtype)


def masked_attention(qkv3, mask_i8, *, num_heads, head_dim, scale):
    """qkv3: [B, S, 3H] fused Q|K|V; mask_i8: [B, S, S] (nonzero = attend) -> [B, S, H]."""
    B, S, threeH = qkv3.shape
    H = num_heads * head_dim
    assert threeH == 3 * H

    # Query tile bounds the per-step score buffer (tq * S f32) so big S fits
    # v7x's 64 MiB VMEM; the K/V slab (constant block index per batch) is
    # fetched once and reused across query tiles.
    tq = min(_round_up(S, 8), 256)
    Sp = _round_up(S, tq)
    if Sp != S:
        qkv3 = jnp.pad(qkv3, ((0, 0), (0, Sp - S), (0, 0)))
        mask_i8 = jnp.pad(mask_i8, ((0, 0), (0, Sp - S), (0, Sp - S)))

    isz = qkv3.dtype.itemsize
    cost = pl.CostEstimate(
        flops=int(4 * B * num_heads * Sp * Sp * head_dim + 8 * B * num_heads * Sp * Sp),
        transcendentals=int(B * num_heads * Sp * Sp),
        bytes_accessed=int(B * (Sp * 3 * H * isz + Sp * Sp + Sp * H * isz)),
    )
    vmem = _vmem_limit(
        2 * Sp * 3 * H * isz               # resident qkv slab (double buffered across batches)
        + 2 * tq * Sp                      # int8 mask tile
        + 2 * tq * H * isz                 # output tile
        + 5 * tq * Sp * 4                  # score / exp / prob transients (f32)
        + num_heads * tq * head_dim * 4    # per-head contexts before the final concat
    )

    kernel = functools.partial(_attention_kernel, num_heads=num_heads,
                               head_dim=head_dim, scale=scale, q_tile=tq)

    ctx = pl.pallas_call(
        kernel,
        out_shape=jax.ShapeDtypeStruct((B, Sp, H), qkv3.dtype),
        grid_spec=pltpu.PrefetchScalarGridSpec(
            num_scalar_prefetch=0,
            grid=(B, Sp // tq),
            in_specs=[
                # full (S, 3H) slab per batch; constant in qi -> no refetch
                pl.BlockSpec((1, Sp, 3 * H), lambda b, qi: (b, 0, 0)),
                # query-tile rows of the mask (int8)
                pl.BlockSpec((1, tq, Sp), lambda b, qi: (b, qi, 0)),
            ],
            out_specs=pl.BlockSpec((1, tq, H), lambda b, qi: (b, qi, 0)),
        ),
        compiler_params=pltpu.CompilerParams(
            dimension_semantics=("parallel", "arbitrary"),
            vmem_limit_bytes=vmem,
        ),
        cost_estimate=cost,
    )(qkv3, mask_i8)
    return ctx[:, :S] if Sp != S else ctx


# ---------------------------------------------------------------------------
# Kernel 3: DebertaV2SelfOutput — dense -> (dropout=identity) -> LayerNorm(x+res)
# ---------------------------------------------------------------------------
def _output_kernel(h_ref, res_ref, w_ref, b_ref, gamma_ref, beta_ref, o_ref, *, eps):
    x = jnp.dot(h_ref[...], w_ref[...], preferred_element_type=jnp.float32)
    x = x + b_ref[...].astype(jnp.float32)
    # StableDropout is identity in eval mode.
    y = x + res_ref[...].astype(jnp.float32)

    mean = jnp.mean(y, axis=-1, keepdims=True)
    c = y - mean
    var = jnp.mean(c * c, axis=-1, keepdims=True)
    inv = jax.lax.rsqrt(var + eps)
    o_ref[...] = (c * inv * gamma_ref[...].astype(jnp.float32)
                  + beta_ref[...].astype(jnp.float32)).astype(o_ref.dtype)


def fused_output(h2, res2, wo_t, bo, gamma, beta, *, eps, tm=None):
    """h2: [M, K], res2: [M, H], wo_t: [K, H] -> LayerNorm(h2 @ wo_t + bo + res2)."""
    M, K = h2.shape
    H = wo_t.shape[1]

    if tm is None:
        tm = _default_row_tile()
    tm = min(tm, _round_up(M, 8))
    Mp = _round_up(M, tm)
    if Mp != M:
        pad = ((0, Mp - M), (0, 0))
        # NOTE: padded rows have var=0 -> rsqrt(eps) blow-up but are sliced off
        # below; never consume them before the [:M] slice.
        h2 = jnp.pad(h2, pad)
        res2 = jnp.pad(res2, pad)

    isz = h2.dtype.itemsize
    wsz = wo_t.dtype.itemsize
    cost = pl.CostEstimate(
        flops=int(2 * Mp * K * H + 10 * Mp * H),
        transcendentals=int(Mp),
        bytes_accessed=int(isz * (Mp * K + 2 * Mp * H) + wsz * (K * H + 3 * H)),
    )
    vmem = _vmem_limit(isz * (2 * tm * K + 4 * tm * H) + wsz * (K * H + 3 * H))

    out = pl.pallas_call(
        functools.partial(_output_kernel, eps=eps),
        out_shape=jax.ShapeDtypeStruct((Mp, H), h2.dtype),
        grid_spec=pltpu.PrefetchScalarGridSpec(
            num_scalar_prefetch=0,
            grid=(Mp // tm,),
            in_specs=[
                pl.BlockSpec((tm, K), lambda i: (i, 0)),   # context tile
                pl.BlockSpec((tm, H), lambda i: (i, 0)),   # residual tile
                pl.BlockSpec((K, H), lambda i: (0, 0)),    # dense weight (resident)
                pl.BlockSpec((1, H), lambda i: (0, 0)),    # dense bias
                pl.BlockSpec((1, H), lambda i: (0, 0)),    # LN gamma
                pl.BlockSpec((1, H), lambda i: (0, 0)),    # LN beta
            ],
            out_specs=pl.BlockSpec((tm, H), lambda i: (i, 0)),
        ),
        compiler_params=pltpu.CompilerParams(
            dimension_semantics=("parallel",),
            vmem_limit_bytes=vmem,
        ),
        cost_estimate=cost,
    )(h2, res2, wo_t, bo.reshape(1, H), gamma.reshape(1, H), beta.reshape(1, H))
    return out[:M]


# ---------------------------------------------------------------------------
# Full DebertaV2Attention forward (inference, relative_attention=False)
# ---------------------------------------------------------------------------
def deberta_v2_attention(hidden_states, attention_mask, params, *, num_heads, eps=1e-7):
    """hidden_states: [B, S, H]; attention_mask: [B, S, S] (nonzero = attend).

    bf16 activations/weights are supported end-to-end (matmuls accumulate f32,
    softmax/LayerNorm stats stay f32) and are the recommended default on
    v6e/v7x; the demo below uses f32 for a tight numerical check.
    """
    # TODO(synk): disentangled relative-attention bias (c2p/p2c log-bucket terms)
    #             and training-mode StableDropout are not implemented (inference
    #             path with relative_attention=False).
    B, S, H = hidden_states.shape
    Dh = H // num_heads
    M = B * S

    x2 = hidden_states.reshape(M, H)

    # Fused Q/K/V projection: single [H, 3H] matmul.
    w_qkv_t = jnp.concatenate([params["wq_t"], params["wk_t"], params["wv_t"]], axis=1)
    b_qkv = jnp.concatenate([params["bq"], params["bk"], params["bv"]], axis=0)
    qkv = dense_pallas(x2, w_qkv_t, b_qkv)                       # [M, 3H]
    qkv3 = qkv.reshape(B, S, 3 * H)                              # free reshape, no transpose

    # Callers should pass bool/int8; only cast if given something wider.
    if attention_mask.dtype != jnp.int8:
        attention_mask = (attention_mask != 0).astype(jnp.int8)

    scale = 1.0 / math.sqrt(float(Dh))        # scale_factor == 1 (no c2p/p2c)
    ctx = masked_attention(qkv3, attention_mask,
                           num_heads=num_heads, head_dim=Dh, scale=scale)  # [B, S, H]

    ctx2 = ctx.reshape(M, H)                  # heads already merged -> free reshape

    out2 = fused_output(ctx2, x2, params["wo_t"], params["bo"],
                        params["gamma"], params["beta"], eps=eps)
    return out2.reshape(B, S, H)


# ---------------------------------------------------------------------------
# Pure-JAX reference (same math as the torch module in eval mode)
# ---------------------------------------------------------------------------
def reference_attention(hidden_states, attention_mask, params, *, num_heads, eps):
    B, S, H = hidden_states.shape
    Dh = H // num_heads
    with jax.default_matmul_precision("highest"):
        q = hidden_states @ params["wq_t"] + params["bq"]
        k = hidden_states @ params["wk_t"] + params["bk"]
        v = hidden_states @ params["wv_t"] + params["bv"]

        def split(t):
            return t.reshape(B, S, num_heads, Dh).transpose(0, 2, 1, 3)

        qh, kh, vh = split(q), split(k), split(v)
        scores = jnp.einsum("bhqd,bhkd->bhqk", qh, kh) / jnp.sqrt(jnp.float32(Dh))
        valid = attention_mask[:, None, :, :] != 0
        scores = jnp.where(valid, scores, jnp.finfo(scores.dtype).min)
        probs = jax.nn.softmax(scores, axis=-1)
        probs = jnp.where(valid, probs, 0.0)
        ctx = jnp.einsum("bhqk,bhkd->bhqd", probs, vh)
        ctx = ctx.transpose(0, 2, 1, 3).reshape(B, S, H)

        y = ctx @ params["wo_t"] + params["bo"] + hidden_states
        mean = y.mean(-1, keepdims=True)
        var = ((y - mean) ** 2).mean(-1, keepdims=True)
        return (y - mean) * jax.lax.rsqrt(var + eps) * params["gamma"] + params["beta"]


if __name__ == "__main__":
    # Small config: batch=2, seq=8, hidden=32, heads=4 (head_dim=8), eps=1e-7.
    B, S, H, NH = 2, 8, 32, 4
    eps = 1e-7

    key = jax.random.PRNGKey(0)
    keys = jax.random.split(key, 6)

    hidden_states = jax.random.normal(keys[0], (B, S, H), dtype=jnp.float32)

    # Padding-style attention mask: batch 0 fully valid, batch 1 keys >= 5 masked.
    lengths = jnp.array([S, 5])
    attn_mask = (jnp.arange(S)[None, None, :] < lengths[:, None, None])
    attn_mask = jnp.broadcast_to(attn_mask, (B, S, S)).astype(jnp.int8)

    def linear_params(k, fan_in, fan_out):
        kw, kb = jax.random.split(k)
        w_t = jax.random.normal(kw, (fan_in, fan_out), dtype=jnp.float32) * 0.2
        b = jax.random.normal(kb, (fan_out,), dtype=jnp.float32) * 0.02
        return w_t, b

    wq_t, bq = linear_params(keys[1], H, H)
    wk_t, bk = linear_params(keys[2], H, H)
    wv_t, bv = linear_params(keys[3], H, H)
    wo_t, bo = linear_params(keys[4], H, H)

    params = dict(
        wq_t=wq_t, bq=bq, wk_t=wk_t, bk=bk, wv_t=wv_t, bv=bv,
        wo_t=wo_t, bo=bo,
        gamma=jnp.ones((H,), jnp.float32),   # LayerNorm weight init
        beta=jnp.zeros((H,), jnp.float32),   # LayerNorm bias init
    )

    out = deberta_v2_attention(hidden_states, attn_mask, params, num_heads=NH, eps=eps)
    out = jax.block_until_ready(out)

    ref = reference_attention(hidden_states, attn_mask, params, num_heads=NH, eps=eps)
    assert out.shape == (B, S, H)
    max_err = float(jnp.max(jnp.abs(out - ref)))
    # tolerance covers the EUP approximate-reciprocal softmax denominator
    assert jnp.allclose(out, ref, atol=3e-3, rtol=3e-3), f"mismatch vs reference (max err {max_err})"

    print("KERNEL_OK")
</pallas_src>

<mosaic_0001>
module attributes {stable_mosaic.version = 11 : i64} {
  func.func @_dense_kernel(%arg0: i32, %arg1: memref<16x32xf32, #tpu.memory_space<vmem>>, %arg2: memref<32x96xf32, #tpu.memory_space<vmem>>, %arg3: memref<1x96xf32, #tpu.memory_space<vmem>>, %arg4: memref<16x96xf32, #tpu.memory_space<vmem>>) attributes {dimension_semantics = [#tpu.dimension_semantics<parallel>], iteration_bounds = array<i64: 1>, scalar_prefetch = 0 : i64, scratch_operands = 0 : i64, tpu.core_type = #tpu.core_type<tc>, window_params = [{transform_indices = @transform_0, window_bounds = array<i64: 16, 32>}, {pipeline_mode = #tpu.pipeline_mode<synchronous>, transform_indices = @transform_1, window_bounds = array<i64: 32, 96>}, {pipeline_mode = #tpu.pipeline_mode<synchronous>, transform_indices = @transform_2, window_bounds = array<i64: 1, 96>}, {transform_indices = @transform_3, window_bounds = array<i64: 16, 96>}]} {
    %c0 = arith.constant 0 : index
    %c0_0 = arith.constant 0 : index
    %0 = vector.load %arg1[%c0, %c0_0] : memref<16x32xf32, #tpu.memory_space<vmem>>, vector<16x32xf32>
    %c0_1 = arith.constant 0 : index
    %c0_2 = arith.constant 0 : index
    %1 = vector.load %arg2[%c0_1, %c0_2] : memref<32x96xf32, #tpu.memory_space<vmem>>, vector<32x96xf32>
    %cst = arith.constant dense<0.000000e+00> : vector<16x96xf32>
    %2 = tpu.matmul %0, %1, %cst {dimension_numbers = #tpu.dot_dimension_numbers<[1], [0], [0], [1], [0, 0, 1, 1], [], []>} : vector<16x32xf32>, vector<32x96xf32>, vector<16x96xf32> -> vector<16x96xf32>
    %c0_3 = arith.constant 0 : index
    %c0_4 = arith.constant 0 : index
    %3 = vector.load %arg3[%c0_3, %c0_4] : memref<1x96xf32, #tpu.memory_space<vmem>>, vector<1x96xf32>
    %4 = vector.broadcast %3 : vector<1x96xf32> to vector<16x96xf32>
    %5 = arith.addf %2, %4 : vector<16x96xf32>
    %c0_5 = arith.constant 0 : index
    %c0_6 = arith.constant 0 : index
    %6 = vector.load %arg4[%c0_5, %c0_6] : memref<16x96xf32, #tpu.memory_space<vmem>>, vector<16x96xf32>
    tpu.vector_store %arg4[%c0_5, %c0_6], %5 {strides = array<i32>} : memref<16x96xf32, #tpu.memory_space<vmem>>, vector<16x96xf32>,
    return
  }
  func.func @transform_0(%arg0: i32) -> (i32, i32) {
    %c0_i32 = arith.constant 0 : i32
    %c0_i32_0 = arith.constant 0 : i32
    return %arg0, %c0_i32 : i32, i32
  }
  func.func @transform_1(%arg0: i32) -> (i32, i32) {
    %c0_i32 = arith.constant 0 : i32
    %c0_i32_0 = arith.constant 0 : i32
    %c0_i32_1 = arith.constant 0 : i32
    return %c0_i32, %c0_i32_0 : i32, i32
  }
  func.func @transform_2(%arg0: i32) -> (i32, i32) {
    %c0_i32 = arith.constant 0 : i32
    %c0_i32_0 = arith.constant 0 : i32
    %c0_i32_1 = arith.constant 0 : i32
    return %c0_i32, %c0_i32_0 : i32, i32
  }
  func.func @transform_3(%arg0: i32) -> (i32, i32) {
    %c0_i32 = arith.constant 0 : i32
    %c0_i32_0 = arith.constant 0 : i32
    return %arg0, %c0_i32 : i32, i32
  }
}

</mosaic_0001>

<bundles_post_ra>
// kernel: tpu_custom_call.1
= control target key start
LH: loop header
LB: loop body
LE: loop exit
PB: predicated region body
PF: predicated region fallthrough
CT: control target
= control target key end

     0   :  { %8 = vsyncpa [#allocation3], 0  ;;  %s337_s0 = inlined_call_operand.hbm [shape: f32[16,32], index: 0, kind: input, shape index: {}]   ;;  %s338_s1 = inlined_call_operand.hbm [shape: f32[32,96], index: 1, kind: input, shape index: {}]   ;;  %s339_s2 = inlined_call_operand.vmem [shape: f32[1,96], index: 2, kind: input, shape index: {}]   ;;  %s340_s3 = inlined_call_operand.hbm [shape: f32[16,96], index: 3, kind: output, shape index: {}]  }
   0x1   :  { %9 = vsyncpa [#allocation6], 0 }
   0x2   :  { %10 = vsyncpa [#allocation4], 0  ;;  %s264_s12 = smov [#allocation2]   ;;  %s192_s16 = scalar_lea.hbm %s337_s0, 256 }
   0x3   :  { %s16_s13 = sshll.u32 %s264_s12, 4  ;;  %p193_p0 = scmp.ne.s32.totalorder %s337_s0, %s192_s16  ;;  %s17_s13 = int_to_ptr.vmem [resolvable:$true] %s16_s13 }
   0x4   :  { %p196_p1 = scmp.lt.u32.totalorder %s192_s16, %s337_s0 }
   0x6   :  { %p198_p2 = pnand %p196_p1, %p193_p0 }
   0x8   :  { %201 = shalt.err (!%p198_p2)
}
   0x9   :  { %s202_s21 = scalar_lea.vmem %s17_s13, 256  ;;  %p207_p4 = scmp.lt.s32.totalorder %s17_s13, %s17_s13 }
   0xa   :  { %p203_p3 = scmp.ne.s32.totalorder %s17_s13, %s202_s21  ;;  %p208_p5 = scmp.lt.s32.totalorder %s202_s21, %s202_s21 }
   0xc   :  { %p209_p6 = por %p208_p5, %p207_p4 }
   0xe   :  { %p210_p7 = pnand %p209_p6, %p203_p3 }
  0x10   :  { %213 = shalt.err (!%p210_p7)
}
  0x11   :  { %s265_s22 = smov 128   ;;  %s266_s23 = smov 8  }
  0x12   :  { %22 = dma.hbm_to_vmem [thread:$0]  %s337_s0, 256, %s17_s13, [#allocation3], %s265_s22, %s265_s22, %s266_s23  }
  0x13   :  { %s267_s26 = smov [#allocation5]   ;;  %s214_s30 = scalar_lea.hbm %s338_s1, 512 }
  0x14   :  { %s28_s27 = sshll.u32 %s267_s26, 4  ;;  %p215_p8 = scmp.ne.s32.totalorder %s338_s1, %s214_s30  ;;  %s29_s27 = int_to_ptr.vmem [resolvable:$true] %s28_s27 }
  0x15   :  { %p218_p9 = scmp.lt.u32.totalorder %s214_s30, %s338_s1 }
  0x17   :  { %p220_p10 = pnand %p218_p9, %p215_p8 }
  0x19   :  { %223 = shalt.err (!%p220_p10)
}
  0x1a   :  { %s224_s8 = scalar_lea.vmem %s29_s27, 512  ;;  %p229_p12 = scmp.lt.s32.totalorder %s29_s27, %s29_s27 }
  0x1b   :  { %p225_p11 = scmp.ne.s32.totalorder %s29_s27, %s224_s8  ;;  %p230_p13 = scmp.lt.s32.totalorder %s224_s8, %s224_s8 }
  0x1d   :  { %p231_p0 = por %p230_p13, %p229_p12 }
  0x1f   :  { %p232_p1 = pnand %p231_p0, %p225_p11 }
  0x21   :  { %235 = shalt.err (!%p232_p1)
}
  0x22   :  { %34 = dma.hbm_to_vmem [thread:$0]  %s338_s1, 512, %s29_s27, [#allocation6], %s265_s22, %s265_s22, %s266_s23  }
  0x23   :  { %258 = dma.done.wait [#allocation3], 256  }
  0x24   :  { %259 = vsyncadd [#allocation3], 4294967040 }
  0x25   :  { %260 = dma.done.wait [#allocation6], 512  }
  0x26   :  { %261 = vsyncadd [#allocation6], 4294966784  ;;  %vm56_vm0 = vcmask 261120   ;;  %v45_v0 = vld [vmem:[#allocation5] sm:$0xff]  ;;  %v46_v1 = vld [vmem:[#allocation5 + $0x8] sm:$0xff]  ;;  %s268_s11 = smov [#allocation7]  }
  0x27   :  { %v47_v2 = vld [vmem:[#allocation5 + $0x10] sm:$0xff]  ;;  %v179_v3 = vpack.c.bf16 %v46_v1, %v45_v0  ;;  %v48_v4 = vld [vmem:[#allocation5 + $0x18] sm:$0xff]  ;;  %s146_s12 = sshll.u32 %s268_s11, 4  ;;  %vm138_vm1 = vcmask 785408   ;;  %s147_s12 = int_to_ptr.vmem [resolvable:$true] %s146_s12 }
  0x28   :  { %v43_v5 = vld [vmem:[#allocation2] sm:$0xff]  ;;  %v183_v6 = vpack.c.bf16 %v48_v4, %v47_v2  ;;  %v44_v7 = vld [vmem:[#allocation2 + $0x8] sm:$0xff]  ;;  %s236_s13 = scalar_lea.vmem %s147_s12, 256  ;;  %p241_p3 = scmp.lt.s32.totalorder %s147_s12, %s147_s12 }
  0x29   :  { %176 = vmatprep.mubr.msk.f32.mxu0 %vm56_vm0, %v43_v5  ;;  %180 = vmatprep.subr.bf16.mxu0 %v179_v3  ;;  %v159_v8 = vld [vmem:[%s339_s2] ss:$0 sm:$0xff]  ;;  %p237_p2 = scmp.ne.s32.totalorder %s147_s12, %s236_s13  ;;  %p242_p4 = scmp.lt.s32.totalorder %s236_s13, %s236_s13 }
  0x2a   :  { %182 = vmatpush3.bf16.msra.mxu0 %v179_v3 }
  0x2b   :  { %184 = vmatprep.subr.bf16.mxu0 %v183_v6  ;;  %p243_p5 = por %p242_p4, %p241_p3 }
  0x2d   :  { %p244_p6 = pnand %p243_p5, %p237_p2 }
  0x2e   :  { %186 = vmatpush3.bf16.msra.mxu0 %v183_v6 }
  0x31   :  { %177 = vmatmul.mubr.msk.f32.vlgmr.msra.gmra.mrb[0].mxu0 %vm56_vm0, %v44_v7 }
 0x104   :  { %v178_v9 = vpop.f32.mrb[0].mxu0 }
 0x105   :  { %v135_v10 = vadd.f32 %v178_v9, %v159_v8  ;;  %v129_v11 = vpop.f32.mrb[1].mxu0 }
 0x106   :  { %v130_v12 = vadd.f32 %v159_v8, %v129_v11 }
 0x107   :  { %140 = vst.msk [vmem:[#allocation7 + $0x8] sm:$0xff] %vm138_vm1, %v135_v10 }
 0x108   :  { %139 = vst.msk [vmem:[#allocation7] sm:$0xff] %vm138_vm1, %v130_v12 }
 0x109   :  { %247 = shalt.err (!%p244_p6)
}
 0x10a   :  { %s248_s2 = scalar_lea.hbm %s340_s3, 256 }
 0x10b   :  { %p249_p7 = scmp.ne.s32.totalorder %s340_s3, %s248_s2  ;;  %p252_p8 = scmp.lt.u32.totalorder %s248_s2, %s340_s3 }
 0x10d   :  { %p254_p9 = pnand %p252_p8, %p249_p7 }
 0x10f   :  { %257 = shalt.err (!%p254_p9)
}
 0x110   :  { %152 = dma.vmem_to_hbm [thread:$0]  %s147_s12, 256, %s340_s3, [#allocation4], %s265_s22, %s265_s22, %s266_s23  }
 0x111   :  { %262 = dma.done.wait [#allocation4], 256  }
 0x112   :  { %263 = vsyncadd [#allocation4], 4294967040 }
 0x113   :  { %156 = vsyncpa [#allocation3], 1 }
 0x114   :  { %157 = vsyncpa [#allocation6], 1 }
 0x115   :  { %158 = vsyncpa [#allocation4], 1 }

</bundles_post_ra>
